<compile_context>
chip_gen: v7x
topology: tpu7x:2x2x1
jax: 0.10.0
libtpu: 0.0.40
codegen_flags: <defaults>
</compile_context>

<pallas_src>
import functools

import jax
import jax.numpy as jnp
from jax.experimental import pallas as pl
from jax.experimental.pallas import tpu as pltpu


def _chebynet_kernel(x_ref, l_ref, w_ref, o_ref):
    """Fused Chebynet forward, everything VMEM-resident, no grid.

    x_ref: (N, B*F_in)     node features, batch folded into lanes
    l_ref: (N, N)          Laplacian-like graph matrix
    w_ref: (K*F_in, F_out) per-order GraphConvolution weights, stacked over K
    o_ref: (B*N, F_out)    relu( sum_k L^k x_b W_k ), batches stacked along rows
    """
    n_nodes = l_ref.shape[0]
    n_batch = o_ref.shape[0] // n_nodes
    f_in = x_ref.shape[1] // n_batch
    k_order = w_ref.shape[0] // f_in

    L = l_ref[...]

    # Chebyshev(-power) recurrence batched over B:
    #   orders[k][:, b*F_in:(b+1)*F_in] == L^k @ x_b
    # One (N,N)@(N,B*F_in) MXU push per extra order; K-1 pushes total.
    orders = [x_ref[...]]                                     # order 0: x  (N, B*F_in)
    for _ in range(1, k_order):
        orders.append(jnp.dot(L, orders[-1], preferred_element_type=jnp.float32))

    # Gather each batch's K order-blocks along lanes -> (N, K*F_in), then stack the
    # batches along rows -> (B*N, K*F_in). A single MXU contraction against the
    # K-stacked weight matrix fuses the K-order sum and the batch loop.
    feats = jnp.concatenate(
        [
            jnp.concatenate(
                [ax[:, b * f_in:(b + 1) * f_in] for ax in orders], axis=-1
            )
            for b in range(n_batch)
        ],
        axis=0,
    )                                                         # (B*N, K*F_in)

    out = jnp.dot(feats, w_ref[...], preferred_element_type=jnp.float32)
    o_ref[...] = jnp.maximum(out, 0.0).astype(o_ref.dtype)


@functools.partial(jax.jit, static_argnames=("K",))
def chebynet_forward(x: jax.Array, L: jax.Array, W: jax.Array, K: int) -> jax.Array:
    """x: (B, N, F_in), L: (N, N), W: (K, F_in, F_out) -> relu(sum_k L^k x W_k)."""
    B, N, F_in = x.shape
    K_w, F_in_w, F_out = W.shape
    assert K_w == K and F_in_w == F_in
    assert L.shape == (N, N)
    assert N % 8 == 0, "N must be sublane-aligned for the row-stacked output"

    # Fold batch into lanes for the L-recurrence; stack weights over K so one matmul
    # performs the K-order sum. Cheap layout-only ops in the wrapper.
    x2 = jnp.transpose(x, (1, 0, 2)).reshape(N, B * F_in)     # (N, B*F_in)
    W2 = W.reshape(K * F_in, F_out)                           # (K*F_in, F_out)

    out2 = pl.pallas_call(
        _chebynet_kernel,
        out_shape=jax.ShapeDtypeStruct((B * N, F_out), x.dtype),
        in_specs=[
            pl.BlockSpec(memory_space=pltpu.MemorySpace.VMEM),   # x2
            pl.BlockSpec(memory_space=pltpu.MemorySpace.VMEM),   # L
            pl.BlockSpec(memory_space=pltpu.MemorySpace.VMEM),   # W2
        ],
        out_specs=pl.BlockSpec(memory_space=pltpu.MemorySpace.VMEM),
    )(x2, L, W2)

    return out2.reshape(B, N, F_out)


def generate_cheby_adj(L: jax.Array, K: int) -> jax.Array:
    """adj[0] = I, adj[1] = L, adj[k] = adj[k-1] @ L  (matches reference code)."""
    n = L.shape[-1]
    supports = [jnp.eye(n, dtype=L.dtype)]
    for i in range(1, K):
        if i == 1:
            supports.append(L)
        else:
            supports.append(jnp.matmul(supports[-1], L))
    return jnp.stack(supports, axis=0)  # (K, N, N)


def chebynet_reference(x, L, W, K):
    """Pure-JAX reference for correctness checking."""
    adj = generate_cheby_adj(L, K)
    result = None
    for k in range(K):
        term = jnp.einsum("nm,bmf,fo->bno", adj[k], x, W[k])
        result = term if result is None else result + term
    return jax.nn.relu(result)


if __name__ == "__main__":
    # Small shapes consistent with the module:
    #   xdim = (B, N, F_in); K Chebyshev orders; num_out = F_out.
    B, N, F_in, F_out, K = 2, 16, 8, 32, 3

    key = jax.random.PRNGKey(0)
    kx, kl, kw = jax.random.split(key, 3)

    x = jax.random.normal(kx, (B, N, F_in), dtype=jnp.float32)

    # Symmetric "Laplacian-like" matrix L (N, N).
    a = jax.random.normal(kl, (N, N), dtype=jnp.float32)
    L = 0.1 * (a + a.T)

    # GraphConvolution weights, xavier-normal-ish deterministic init, one per order k.
    std = (2.0 / (F_in + F_out)) ** 0.5
    W = std * jax.random.normal(kw, (K, F_in, F_out), dtype=jnp.float32)

    # TODO(synk): self.dp (nn.Dropout) is declared in __init__ but never applied in
    # forward(), so it is intentionally omitted here.

    out = chebynet_forward(x, L, W, K)
    out = jax.block_until_ready(out)

    ref = chebynet_reference(x, L, W, K)
    assert out.shape == (B, N, F_out)
    assert jnp.allclose(out, ref, atol=1e-4, rtol=1e-4), "mismatch vs reference"

    print("KERNEL_OK")
</pallas_src>

<mosaic_0001>
module attributes {stable_mosaic.version = 11 : i64} {
  func.func @_chebynet_kernel(%arg0: memref<16x16xf32, #tpu.memory_space<vmem>>, %arg1: memref<16x16xf32, #tpu.memory_space<vmem>>, %arg2: memref<24x32xf32, #tpu.memory_space<vmem>>, %arg3: memref<32x32xf32, #tpu.memory_space<vmem>>) attributes {dimension_semantics = [], scalar_prefetch = 0 : i64, scratch_operands = 0 : i64, tpu.core_type = #tpu.core_type<tc>} {
    %c0 = arith.constant 0 : index
    %c0_0 = arith.constant 0 : index
    %0 = vector.load %arg1[%c0, %c0_0] : memref<16x16xf32, #tpu.memory_space<vmem>>, vector<16x16xf32>
    %c0_1 = arith.constant 0 : index
    %c0_2 = arith.constant 0 : index
    %1 = vector.load %arg0[%c0_1, %c0_2] : memref<16x16xf32, #tpu.memory_space<vmem>>, vector<16x16xf32>
    %cst = arith.constant dense<0.000000e+00> : vector<16x16xf32>
    %2 = tpu.matmul %0, %1, %cst {dimension_numbers = #tpu.dot_dimension_numbers<[1], [0], [0], [1], [0, 0, 1, 1], [], []>} : vector<16x16xf32>, vector<16x16xf32>, vector<16x16xf32> -> vector<16x16xf32>
    %cst_3 = arith.constant dense<0.000000e+00> : vector<16x16xf32>
    %3 = tpu.matmul %0, %2, %cst_3 {dimension_numbers = #tpu.dot_dimension_numbers<[1], [0], [0], [1], [0, 0, 1, 1], [], []>} : vector<16x16xf32>, vector<16x16xf32>, vector<16x16xf32> -> vector<16x16xf32>
    %4 = vector.extract_strided_slice %1 {offsets = [0, 0], sizes = [16, 8], strides = [1, 1]} : vector<16x16xf32> to vector<16x8xf32>
    %5 = vector.extract_strided_slice %2 {offsets = [0, 0], sizes = [16, 8], strides = [1, 1]} : vector<16x16xf32> to vector<16x8xf32>
    %6 = vector.extract_strided_slice %3 {offsets = [0, 0], sizes = [16, 8], strides = [1, 1]} : vector<16x16xf32> to vector<16x8xf32>
    %7 = tpu.concatenate %4, %5, %6 in 1 : vector<16x8xf32>, vector<16x8xf32>, vector<16x8xf32> -> vector<16x24xf32>
    %8 = vector.extract_strided_slice %1 {offsets = [0, 8], sizes = [16, 8], strides = [1, 1]} : vector<16x16xf32> to vector<16x8xf32>
    %9 = vector.extract_strided_slice %2 {offsets = [0, 8], sizes = [16, 8], strides = [1, 1]} : vector<16x16xf32> to vector<16x8xf32>
    %10 = vector.extract_strided_slice %3 {offsets = [0, 8], sizes = [16, 8], strides = [1, 1]} : vector<16x16xf32> to vector<16x8xf32>
    %11 = tpu.concatenate %8, %9, %10 in 1 : vector<16x8xf32>, vector<16x8xf32>, vector<16x8xf32> -> vector<16x24xf32>
    %12 = tpu.concatenate %7, %11 in 0 : vector<16x24xf32>, vector<16x24xf32> -> vector<32x24xf32>
    %c0_4 = arith.constant 0 : index
    %c0_5 = arith.constant 0 : index
    %13 = vector.load %arg2[%c0_4, %c0_5] : memref<24x32xf32, #tpu.memory_space<vmem>>, vector<24x32xf32>
    %cst_6 = arith.constant dense<0.000000e+00> : vector<32x32xf32>
    %14 = tpu.matmul %12, %13, %cst_6 {dimension_numbers = #tpu.dot_dimension_numbers<[1], [0], [0], [1], [0, 0, 1, 1], [], []>} : vector<32x24xf32>, vector<24x32xf32>, vector<32x32xf32> -> vector<32x32xf32>
    %cst_7 = arith.constant 0.000000e+00 : f32
    %15 = vector.broadcast %cst_7 : f32 to vector<32x32xf32>
    %16 = arith.maximumf %14, %15 : vector<32x32xf32>
    %c0_8 = arith.constant 0 : index
    %c0_9 = arith.constant 0 : index
    %17 = vector.load %arg3[%c0_8, %c0_9] : memref<32x32xf32, #tpu.memory_space<vmem>>, vector<32x32xf32>
    tpu.vector_store %arg3[%c0_8, %c0_9], %16 {strides = array<i32>} : memref<32x32xf32, #tpu.memory_space<vmem>>, vector<32x32xf32>,
    return
  }
}

</mosaic_0001>

<bundles_post_ra>
// kernel: chebynet_forward.1
= control target key start
LH: loop header
LB: loop body
LE: loop exit
PB: predicated region body
PF: predicated region fallthrough
CT: control target
= control target key end

     0   :  { %vm19_vm0 = vcmask 130048   ;;  %s506_s0 = inlined_call_operand.vmem [shape: f32[16,16], index: 0, kind: input, shape index: {}]   ;;  %s507_s1 = inlined_call_operand.vmem [shape: f32[16,16], index: 1, kind: input, shape index: {}]   ;;  %s508_s2 = inlined_call_operand.vmem [shape: f32[24,32], index: 2, kind: input, shape index: {}]   ;;  %s509_s3 = inlined_call_operand.hbm [shape: f32[32,32], index: 3, kind: output, shape index: {}]  }
   0x1   :  { %v17_v0 = vld [vmem:[%s506_s0] sm:$0xff]  ;;  %v18_v1 = vld [vmem:[%s506_s0 + $0x8] sm:$0xff] }
   0x2   :  { %v15_v2 = vld [vmem:[%s507_s1] sm:$0xff]  ;;  %v390_v3 = vpack.c.bf16 %v18_v1, %v17_v0 }
   0x3   :  { %368 = vmatprep.mubr.msk.f32.mxu1 %vm19_vm0, %v15_v2 }
   0x4   :  { %8 = vsyncpa [#allocation3], 0  ;;  %391 = vmatprep.subr.bf16.mxu1 %v390_v3  ;;  %v16_v4 = vld [vmem:[%s507_s1 + $0x8] sm:$0xff]  ;;  %s431_s0 = smov 8   ;;  %s432_s20 = smov 120   ;;  %v215_v8 = vld [vmem:[%s508_s2] sm:$0xff] }
   0x5   :  { %393 = vmatpush3.bf16.msra.mxu1 %v390_v3  ;;  %v216_v9 = vld [vmem:[%s508_s2 + $0x8] sm:$0xff]  ;;  %v217_v11 = vld [vmem:[%s508_s2 + $0x10] sm:$0xff]  ;;  %s433_s26 = smov 16   ;;  %vm192_vm1 = vcmask 64512   ;;  %vm218_vm2 = vcmask 195584   ;;  %vm320_vm3 = vcmask 261120  }
   0x6   :  { %v398_v10 = vpack.c.bf16 %v216_v9, %v215_v8  ;;  %s434_s2 = smov [#allocation2]  }
   0x7   :  { %s330_s27 = sshll.u32 %s434_s2, 4  ;;  %s331_s27 = int_to_ptr.vmem [resolvable:$true] %s330_s27 }
   0x8   :  { %369 = vmatmul.mubr.msk.f32.vlgmr.msra.gmra.mrb[0].mxu1 %vm19_vm0, %v16_v4  ;;  %399 = vmatprep.subr.bf16.mxu0 %v398_v10  ;;  %s407_s28 = scalar_lea.vmem %s331_s27, 512  ;;  %p412_p1 = scmp.lt.s32.totalorder %s331_s27, %s331_s27 }
   0x9   :  { %375 = vmatprep.mubr.msk.f32.mxu1 %vm19_vm0, %v15_v2  ;;  %401 = vmatpush3.bf16.msra.mxu0 %v398_v10  ;;  %p408_p0 = scmp.ne.s32.totalorder %s331_s27, %s407_s28  ;;  %p413_p2 = scmp.lt.s32.totalorder %s407_s28, %s407_s28 }
   0xa   :  { %382 = vmatprep.subr.mxu0 %v217_v11 }
   0xb   :  { %p414_p3 = por %p413_p2, %p412_p1 }
   0xd   :  { %383 = vmatpush3.msra.mxu0 %v217_v11  ;;  %p415_p4 = pnand %p414_p3, %p408_p0 }
  0xdb   :  { %v370_v5 = vpop.f32.mrb[0].mxu1 }
  0xdc   :  { %180 = vrot.lane.b32.xlu0 %v370_v5, %s431_s0  ;;  %v92_v6 = vpop.f32.mrb[1].mxu1 }
  0xdd   :  { %v394_v7 = vpack.c.bf16 %v370_v5, %v92_v6 }
  0xdf   :  { %395 = vmatprep.subr.bf16.mxu1 %v394_v7 }
  0xe0   :  { %178 = vrot.lane.b32.xlu0 %v92_v6, %s431_s0  ;;  %397 = vmatpush3.bf16.msra.mxu1 %v394_v7 }
  0xe3   :  { %376 = vmatmul.mubr.msk.f32.vlgmr.msra.gmra.mrb[2].mxu1 %vm19_vm0, %v16_v4 }
  0xe4   :  { %199 = vrot.lane.b32.xlu0 %v17_v0, %s432_s20 }
 0x14e   :  { %v181_v14 = vpop.permute.xlu0 %180 }
 0x14f   :  { %v194_v21 = vsel %vm192_vm1, %v18_v1, %v181_v14 }
 0x152   :  { %v179_v15 = vpop.permute.xlu0 %178 }
 0x153   :  { %v193_v18 = vsel %vm192_vm1, %v17_v0, %v179_v15 }
 0x156   :  { %v200_v16 = vpop.permute.xlu0 %199 }
 0x157   :  { %v211_v23 = vsel %vm192_vm1, %v200_v16, %v92_v6 }
 0x1b6   :  { %v377_v12 = vpop.f32.mrb[2].mxu1 }
 0x1b7   :  { %188 = vrot.lane.b32.xlu1 %v377_v12, %s433_s26  ;;  %v167_v13 = vpop.f32.mrb[3].mxu1 }
 0x1b8   :  { %205 = vrot.lane.b32.xlu0 %v167_v13, %s431_s0 }
 0x1bb   :  { %186 = vrot.lane.b32.xlu1 %v167_v13, %s433_s26 }
 0x1bf   :  { %201 = vrot.lane.b32.xlu1 %v18_v1, %s432_s20 }
 0x1c3   :  { %207 = vrot.lane.b32.xlu1 %v377_v12, %s431_s0 }
 0x229   :  { %v189_v17 = vpop.permute.xlu1 %188 }
 0x22a   :  { %v206_v19 = vpop.permute.xlu0 %205  ;;  %v196_v24 = vsel %vm19_vm0, %v194_v21, %v189_v17 }
 0x22b   :  { %v213_v25 = vsel %vm19_vm0, %v211_v23, %v206_v19 }
 0x22d   :  { %v187_v20 = vpop.permute.xlu1 %186 }
 0x22e   :  { %v195_v22 = vsel %vm19_vm0, %v193_v18, %v187_v20 }
 0x22f   :  { %384 = vmatprep.mubr.msk.f32.mxu0 %vm218_vm2, %v195_v22 }
 0x230   :  { %385 = vmatmul.mubr.msk.f32.vlgmr.msra.gmra.mrb[0].mxu0 %vm218_vm2, %v196_v24 }
 0x231   :  { %387 = vmatprep.mubr.msk.f32.mxu0 %vm218_vm2, %v213_v25  ;;  %v202_v26 = vpop.permute.xlu1 %201 }
 0x232   :  { %v212_v27 = vsel %vm192_vm1, %v202_v26, %v370_v5 }
 0x235   :  { %v208_v28 = vpop.permute.xlu1 %207 }
 0x236   :  { %v214_v29 = vsel %vm19_vm0, %v212_v27, %v208_v28 }
 0x237   :  { %388 = vmatmul.mubr.msk.f32.gmra.mrb[2].mxu0 %vm218_vm2, %v214_v29 }
 0x303   :  { %v386_v30 = vpop.f32.mrb[0].mxu0 }
 0x304   :  { %v317_v31 = vmax.f32 %v386_v30, 0.0  ;;  %v297_v32 = vpop.f32.mrb[1].mxu0 }
 0x305   :  { %v316_v33 = vmax.f32 %v297_v32, 0.0 }
 0x306   :  { %322 = vst.msk [vmem:[#allocation2 + $0x8] sm:$0xff] %vm320_vm3, %v317_v31 }
 0x307   :  { %321 = vst.msk [vmem:[#allocation2] sm:$0xff] %vm320_vm3, %v316_v33 }
 0x30a   :  { %v389_v34 = vpop.f32.mrb[2].mxu0 }
 0x30b   :  { %v319_v35 = vmax.f32 %v389_v34, 0.0  ;;  %v307_v36 = vpop.f32.mrb[3].mxu0 }
 0x30c   :  { %v318_v37 = vmax.f32 %v307_v36, 0.0 }
 0x30d   :  { %324 = vst.msk [vmem:[#allocation2 + $0x18] sm:$0xff] %vm320_vm3, %v319_v35 }
 0x30e   :  { %323 = vst.msk [vmem:[#allocation2 + $0x10] sm:$0xff] %vm320_vm3, %v318_v37 }
 0x30f   :  { %418 = shalt.err (!%p415_p4)
}
 0x310   :  { %s419_s4 = scalar_lea.hbm %s509_s3, 512 }
 0x311   :  { %p420_p5 = scmp.ne.s32.totalorder %s509_s3, %s419_s4  ;;  %p423_p6 = scmp.lt.u32.totalorder %s419_s4, %s509_s3 }
 0x313   :  { %p425_p7 = pnand %p423_p6, %p420_p5 }
 0x315   :  { %428 = shalt.err (!%p425_p7)
}
 0x316   :  { %s435_s9 = smov 128  }
 0x317   :  { %336 = dma.vmem_to_hbm [thread:$0]  %s331_s27, 512, %s509_s3, [#allocation3], %s435_s9, %s435_s9, %s431_s0  }
 0x318   :  { %429 = dma.done.wait [#allocation3], 512  }
 0x319   :  { %430 = vsyncadd [#allocation3], 4294966784 }
 0x31a   :  { %340 = vsyncpa [#allocation3], 1 }

</bundles_post_ra>
